<compile_context>
chip_gen: v5e
topology: v5e:2x2
jax: 0.10.0
libtpu: 0.0.40
codegen_flags: <defaults>
</compile_context>

<pallas_src>
import functools

import jax
import jax.numpy as jnp
from jax.experimental import pallas as pl
from jax.experimental.pallas import tpu as pltpu


def _round_up(n, m):
    return ((n + m - 1) // m) * m


_VMEM_CAP = None


def _vmem_capacity_bytes():
    """Per-core VMEM capacity (cached); conservative 64 MiB fallback."""
    global _VMEM_CAP
    if _VMEM_CAP is None:
        cap = 64 * 1024 * 1024
        try:
            cap = int(pltpu.get_tpu_info().vmem_capacity_bytes)
        except Exception:
            pass
        _VMEM_CAP = cap
    return _VMEM_CAP


# ---------------------------------------------------------------------------
# Kernels
# ---------------------------------------------------------------------------

def _blinear_epilogue(x, e1, e2, wmu_t, wvar_t, b_mu, b_sig, y_ref):
    # Two MXU matmuls (bf16 operands, f32 accumulation), f32 epilogue.
    mean = jnp.dot(x, wmu_t, preferred_element_type=jnp.float32)        # (T, tn)
    var = jnp.dot(x * x, wvar_t, preferred_element_type=jnp.float32)    # (T, tn) >= 0
    y = mean + jnp.sqrt(var) * e1 + (b_mu + b_sig * e2)
    y_ref[...] = y.astype(y_ref.dtype)


def _blinear_eps_kernel(x_ref, e1_ref, e2_ref, wmu_ref, wvar_ref,
                        bmu_ref, bsig_ref, y_ref):
    """Explicit-noise variant (used by the reference/parity test)."""
    _blinear_epilogue(x_ref[...], e1_ref[...], e2_ref[...],
                      wmu_ref[...], wvar_ref[...],
                      bmu_ref[...], bsig_ref[...], y_ref)


def _blinear_prng_kernel(seed_ref, x_ref, wmu_ref, wvar_ref,
                         bmu_ref, bsig_ref, y_ref):
    """In-kernel noise variant: no eps HBM streams at all."""
    step = pl.program_id(0) * pl.num_programs(1) + pl.program_id(1)
    pltpu.prng_seed(seed_ref[0] + step)          # distinct stream per output tile
    shape = (y_ref.shape[0], y_ref.shape[1])
    e1 = pltpu.stateful_normal(shape, jnp.float32)
    e2 = pltpu.stateful_normal(shape, jnp.float32)
    _blinear_epilogue(x_ref[...], e1, e2,
                      wmu_ref[...], wvar_ref[...],
                      bmu_ref[...], bsig_ref[...], y_ref)


# ---------------------------------------------------------------------------
# Wrapper
# ---------------------------------------------------------------------------

def _blinear_impl(x, w_mu, w_lsigma, b_mu, b_lsigma, *, eps, seed,
                  tile_rows, mxu_dtype):
    Nb, Ns, N_in = x.shape
    N_out = w_mu.shape[0]
    M = Nb * Ns
    f32 = jnp.float32
    out_dtype = x.dtype

    vmem_cap = _vmem_capacity_bytes()
    vmem_cap_lim = max(min(vmem_cap - 16 * 1024 * 1024, (vmem_cap * 7) // 8),
                       16 * 1024 * 1024)

    # Row tile: 512 where 128 MiB VMEM is available (v5e/v6e), 256 on v7x.
    if tile_rows is None:
        tile_rows = 512 if vmem_cap >= 96 * 1024 * 1024 else 256
    tile = min(tile_rows, _round_up(M, 8))
    M_p = _round_up(M, tile)

    # Lane-dense padding of the reduce axis; output-column tiling keeps the
    # resident (double-buffered) weight blocks within ~1/4 of VMEM.
    Ni_p = _round_up(N_in, 128)
    No_full = _round_up(N_out, 128)
    w_budget_elems = max(vmem_cap // 32, 256 * 1024)
    if Ni_p * No_full <= w_budget_elems:
        tn = No_full
    else:
        tn = max(256, ((w_budget_elems // Ni_p) // 256) * 256)   # full MXU width
        tn = min(tn, No_full)
    No_p = _round_up(N_out, tn)
    # TODO(synk): very large N_in would also want a trailing "arbitrary" K grid
    # axis with an f32 VMEM accumulator (pl.when init/finalize); not needed here.
    # TODO(synk): single-buffering the grid-invariant weight blocks via
    # pipeline_mode=pl.Buffered(1) would halve their VMEM further.

    # Grid-invariant parameter transforms, hoisted to XLA (done once, not per step).
    w_mu_t = w_mu.astype(f32).T.astype(mxu_dtype)                 # (N_in, N_out)
    w_sigma = jnp.exp(w_lsigma.astype(f32))
    w_var_t = (w_sigma * w_sigma).T.astype(mxu_dtype)             # (N_in, N_out)
    b_mu2 = b_mu.reshape(1, N_out).astype(f32)
    b_sig2 = jnp.exp(b_lsigma.reshape(1, N_out).astype(f32))

    def pad2(a, rows, cols):
        pr, pc = rows - a.shape[0], cols - a.shape[1]
        if pr == 0 and pc == 0:
            return a
        return jnp.pad(a, ((0, pr), (0, pc)))

    x2 = pad2(x.reshape(M, N_in).astype(mxu_dtype), M_p, Ni_p)
    w_mu_t = pad2(w_mu_t, Ni_p, No_p)
    w_var_t = pad2(w_var_t, Ni_p, No_p)
    b_mu2 = pad2(b_mu2, 1, No_p)
    b_sig2 = pad2(b_sig2, 1, No_p)

    grid = (M_p // tile, No_p // tn)
    has_eps = eps is not None
    op_b = jnp.dtype(mxu_dtype).itemsize
    out_b = jnp.dtype(out_dtype).itemsize

    # Explicit VMEM budget for the (double-buffered) pipeline blocks.
    vmem_need = (
        2 * tile * Ni_p * op_b                       # x
        + 2 * 2 * Ni_p * tn * op_b                   # w_mu^T, sigma_w^2^T
        + 2 * 2 * 8 * tn * 4                         # biases (sublane padded)
        + 2 * tile * tn * out_b                      # y
        + (2 * 2 * tile * tn * 4 if has_eps else 0)  # streamed eps1/eps2
        + 2 * tile * tn * 4                          # f32 in-kernel temporaries
    )
    vmem_limit = int(min(max(2 * vmem_need, 16 * 1024 * 1024), vmem_cap_lim))

    if has_eps:
        e1 = pad2(eps[0].reshape(M, N_out).astype(f32), M_p, No_p)
        e2 = pad2(eps[1].reshape(M, N_out).astype(f32), M_p, No_p)
        in_specs = [
            pl.BlockSpec((tile, Ni_p), lambda i, j: (i, 0)),   # x rows
            pl.BlockSpec((tile, tn), lambda i, j: (i, j)),     # eps1
            pl.BlockSpec((tile, tn), lambda i, j: (i, j)),     # eps2
            pl.BlockSpec((Ni_p, tn), lambda i, j: (0, j)),     # w_mu^T
            pl.BlockSpec((Ni_p, tn), lambda i, j: (0, j)),     # sigma_w^2 ^T
            pl.BlockSpec((1, tn), lambda i, j: (0, j)),        # b_mu
            pl.BlockSpec((1, tn), lambda i, j: (0, j)),        # sigma_b
        ]
        out_spec = pl.BlockSpec((tile, tn), lambda i, j: (i, j))
        operands = (x2, e1, e2, w_mu_t, w_var_t, b_mu2, b_sig2)
        kernel = _blinear_eps_kernel
        nsp = 0
    else:
        # seed is a (1,) int32 scalar-prefetch operand (lands in SMEM); index
        # maps receive its ref as a trailing positional arg.
        in_specs = [
            pl.BlockSpec((tile, Ni_p), lambda i, j, s: (i, 0)),
            pl.BlockSpec((Ni_p, tn), lambda i, j, s: (0, j)),
            pl.BlockSpec((Ni_p, tn), lambda i, j, s: (0, j)),
            pl.BlockSpec((1, tn), lambda i, j, s: (0, j)),
            pl.BlockSpec((1, tn), lambda i, j, s: (0, j)),
        ]
        out_spec = pl.BlockSpec((tile, tn), lambda i, j, s: (i, j))
        operands = (seed, x2, w_mu_t, w_var_t, b_mu2, b_sig2)
        kernel = _blinear_prng_kernel
        nsp = 1

    y2 = pl.pallas_call(
        kernel,
        out_shape=jax.ShapeDtypeStruct((M_p, No_p), out_dtype),
        grid_spec=pltpu.PrefetchScalarGridSpec(
            num_scalar_prefetch=nsp,
            grid=grid,
            in_specs=in_specs,
            out_specs=out_spec,
        ),
        compiler_params=pltpu.CompilerParams(
            dimension_semantics=("parallel", "parallel"),
            vmem_limit_bytes=vmem_limit,
        ),
    )(*operands)

    if (M_p, No_p) != (M, N_out):
        y2 = y2[:M, :N_out]
    return y2.reshape(Nb, Ns, N_out)


@functools.partial(jax.jit, static_argnames=("tile_rows", "mxu_dtype"))
def blinear_apply(x, eps1, eps2, w_mu, w_lsigma, b_mu, b_lsigma, *,
                  tile_rows=None, mxu_dtype=jnp.bfloat16):
    """BLinear forward with caller-supplied N(0,1) noise of shape (Nb, Ns, N_out)."""
    return _blinear_impl(x, w_mu, w_lsigma, b_mu, b_lsigma,
                         eps=(eps1, eps2), seed=None,
                         tile_rows=tile_rows, mxu_dtype=mxu_dtype)


@functools.partial(jax.jit, static_argnames=("tile_rows", "mxu_dtype"))
def _blinear_apply_prng(seed, x, w_mu, w_lsigma, b_mu, b_lsigma, *,
                        tile_rows, mxu_dtype):
    return _blinear_impl(x, w_mu, w_lsigma, b_mu, b_lsigma,
                         eps=None, seed=seed,
                         tile_rows=tile_rows, mxu_dtype=mxu_dtype)


def blinear_forward(x, w_mu, w_lsigma, b_mu, b_lsigma, key, *,
                    tile_rows=None, mxu_dtype=jnp.bfloat16):
    """Module-style forward: fresh N(0,1) noise per call (like torch.randn),
    sampled inside the kernel (no eps HBM streams)."""
    if hasattr(pltpu, "stateful_normal"):
        try:
            seed = jax.random.randint(key, (1,), 0, jnp.iinfo(jnp.int32).max,
                                      dtype=jnp.int32)
            return _blinear_apply_prng(seed, x, w_mu, w_lsigma, b_mu, b_lsigma,
                                       tile_rows=tile_rows, mxu_dtype=mxu_dtype)
        except Exception:
            pass  # fall back to streamed noise below (same distribution)
    Nb, Ns, _ = x.shape
    N_out = w_mu.shape[0]
    k1, k2 = jax.random.split(key)
    eps1 = jax.random.normal(k1, (Nb, Ns, N_out), jnp.float32)
    eps2 = jax.random.normal(k2, (Nb, Ns, N_out), jnp.float32)
    return blinear_apply(x, eps1, eps2, w_mu, w_lsigma, b_mu, b_lsigma,
                         tile_rows=tile_rows, mxu_dtype=mxu_dtype)


def blinear_reference(x, eps1, eps2, w_mu, w_lsigma, b_mu, b_lsigma):
    """Pure-JAX (non-MXU) reference of the same reparameterized forward."""
    w_sigma = jnp.exp(w_lsigma)
    mean = jnp.sum(w_mu[None, None] * x[:, :, None, :], axis=-1)
    var = jnp.sum((w_sigma * w_sigma)[None, None] * (x * x)[:, :, None, :], axis=-1)
    bias = b_mu + jnp.exp(b_lsigma) * eps2
    return mean + jnp.sqrt(var) * eps1 + bias


if __name__ == "__main__":
    # Small shapes consistent with the module's (N_batch, N_samples, N_in) input.
    Nb, Ns, N_in, N_out = 2, 8, 32, 16
    sigma_initial, mumax_initial = 0.1, 1.0

    key = jax.random.PRNGKey(0)
    k_wmu, k_bmu, k_x, k_e1, k_e2, k_fwd = jax.random.split(key, 6)

    # Deterministic parameter init (mirrors BLinear.__init__).
    w_mu = jax.random.uniform(k_wmu, (N_out, N_in), jnp.float32,
                              minval=-mumax_initial, maxval=mumax_initial)
    w_lsigma = jnp.full((N_out, N_in), jnp.log(sigma_initial), jnp.float32)
    b_mu = jax.random.uniform(k_bmu, (N_out,), jnp.float32,
                              minval=-mumax_initial, maxval=mumax_initial)
    b_lsigma = jnp.full((N_out,), jnp.log(sigma_initial), jnp.float32)

    x = jax.random.normal(k_x, (Nb, Ns, N_in), jnp.float32)
    eps1 = jax.random.normal(k_e1, (Nb, Ns, N_out), jnp.float32)
    eps2 = jax.random.normal(k_e2, (Nb, Ns, N_out), jnp.float32)

    y_ref = blinear_reference(x, eps1, eps2, w_mu, w_lsigma, b_mu, b_lsigma)

    # 1) Exact-parity check: f32 MXU operands vs. the pure-JAX reference.
    y32 = jax.block_until_ready(
        blinear_apply(x, eps1, eps2, w_mu, w_lsigma, b_mu, b_lsigma,
                      mxu_dtype=jnp.float32))
    assert y32.shape == (Nb, Ns, N_out)
    assert jnp.allclose(y32, y_ref, atol=2e-4, rtol=2e-4), "f32 path mismatch"

    # 2) Default perf path: bf16 MXU operands, f32 accumulation (operand rounding
    #    only -> loose tolerance; exact parity already verified above).
    ybf = jax.block_until_ready(
        blinear_apply(x, eps1, eps2, w_mu, w_lsigma, b_mu, b_lsigma))
    assert ybf.shape == (Nb, Ns, N_out)
    assert jnp.allclose(ybf, y_ref, atol=1e-1, rtol=1e-1), "bf16 path drifted"

    # 3) Module-style forward: noise drawn inside the kernel, equivalent in
    #    distribution to the PyTorch forward.
    # TODO(synk): exact torch.randn noise values are not reproducible bitwise.
    y2 = jax.block_until_ready(
        blinear_forward(x, w_mu, w_lsigma, b_mu, b_lsigma, k_fwd))
    assert y2.shape == (Nb, Ns, N_out)
    assert bool(jnp.all(jnp.isfinite(y2)))

    print("KERNEL_OK")
</pallas_src>

<mosaic_0001>
module attributes {stable_mosaic.version = 11 : i64} {
  func.func @_blinear_eps_kernel(%arg0: i32, %arg1: i32, %arg2: memref<16x128xf32, #tpu.memory_space<vmem>>, %arg3: memref<16x128xf32, #tpu.memory_space<vmem>>, %arg4: memref<16x128xf32, #tpu.memory_space<vmem>>, %arg5: memref<128x128xf32, #tpu.memory_space<vmem>>, %arg6: memref<128x128xf32, #tpu.memory_space<vmem>>, %arg7: memref<1x128xf32, #tpu.memory_space<vmem>>, %arg8: memref<1x128xf32, #tpu.memory_space<vmem>>, %arg9: memref<16x128xf32, #tpu.memory_space<vmem>>) attributes {dimension_semantics = [#tpu.dimension_semantics<parallel>, #tpu.dimension_semantics<parallel>], iteration_bounds = array<i64: 1, 1>, scalar_prefetch = 0 : i64, scratch_operands = 0 : i64, tpu.core_type = #tpu.core_type<tc>, window_params = [{transform_indices = @transform_0, window_bounds = array<i64: 16, 128>}, {transform_indices = @transform_1, window_bounds = array<i64: 16, 128>}, {transform_indices = @transform_2, window_bounds = array<i64: 16, 128>}, {transform_indices = @transform_3, window_bounds = array<i64: 128, 128>}, {transform_indices = @transform_4, window_bounds = array<i64: 128, 128>}, {transform_indices = @transform_5, window_bounds = array<i64: 1, 128>}, {transform_indices = @transform_6, window_bounds = array<i64: 1, 128>}, {transform_indices = @transform_7, window_bounds = array<i64: 16, 128>}]} {
    %c0 = arith.constant 0 : index
    %c0_0 = arith.constant 0 : index
    %0 = vector.load %arg2[%c0, %c0_0] : memref<16x128xf32, #tpu.memory_space<vmem>>, vector<16x128xf32>
    %c0_1 = arith.constant 0 : index
    %c0_2 = arith.constant 0 : index
    %1 = vector.load %arg3[%c0_1, %c0_2] : memref<16x128xf32, #tpu.memory_space<vmem>>, vector<16x128xf32>
    %c0_3 = arith.constant 0 : index
    %c0_4 = arith.constant 0 : index
    %2 = vector.load %arg4[%c0_3, %c0_4] : memref<16x128xf32, #tpu.memory_space<vmem>>, vector<16x128xf32>
    %c0_5 = arith.constant 0 : index
    %c0_6 = arith.constant 0 : index
    %3 = vector.load %arg5[%c0_5, %c0_6] : memref<128x128xf32, #tpu.memory_space<vmem>>, vector<128x128xf32>
    %c0_7 = arith.constant 0 : index
    %c0_8 = arith.constant 0 : index
    %4 = vector.load %arg6[%c0_7, %c0_8] : memref<128x128xf32, #tpu.memory_space<vmem>>, vector<128x128xf32>
    %c0_9 = arith.constant 0 : index
    %c0_10 = arith.constant 0 : index
    %5 = vector.load %arg7[%c0_9, %c0_10] : memref<1x128xf32, #tpu.memory_space<vmem>>, vector<1x128xf32>
    %c0_11 = arith.constant 0 : index
    %c0_12 = arith.constant 0 : index
    %6 = vector.load %arg8[%c0_11, %c0_12] : memref<1x128xf32, #tpu.memory_space<vmem>>, vector<1x128xf32>
    %cst = arith.constant dense<0.000000e+00> : vector<16x128xf32>
    %7 = tpu.matmul %0, %3, %cst {dimension_numbers = #tpu.dot_dimension_numbers<[1], [0], [0], [1], [0, 0, 1, 1], [], []>} : vector<16x128xf32>, vector<128x128xf32>, vector<16x128xf32> -> vector<16x128xf32>
    %8 = arith.mulf %0, %0 : vector<16x128xf32>
    %cst_13 = arith.constant dense<0.000000e+00> : vector<16x128xf32>
    %9 = tpu.matmul %8, %4, %cst_13 {dimension_numbers = #tpu.dot_dimension_numbers<[1], [0], [0], [1], [0, 0, 1, 1], [], []>} : vector<16x128xf32>, vector<128x128xf32>, vector<16x128xf32> -> vector<16x128xf32>
    %10 = math.sqrt %9 : vector<16x128xf32>
    %11 = arith.mulf %10, %1 : vector<16x128xf32>
    %12 = arith.addf %7, %11 : vector<16x128xf32>
    %13 = vector.broadcast %6 : vector<1x128xf32> to vector<16x128xf32>
    %14 = arith.mulf %13, %2 : vector<16x128xf32>
    %15 = vector.broadcast %5 : vector<1x128xf32> to vector<16x128xf32>
    %16 = arith.addf %15, %14 : vector<16x128xf32>
    %17 = arith.addf %12, %16 : vector<16x128xf32>
    %c0_14 = arith.constant 0 : index
    %c0_15 = arith.constant 0 : index
    %18 = vector.load %arg9[%c0_14, %c0_15] : memref<16x128xf32, #tpu.memory_space<vmem>>, vector<16x128xf32>
    tpu.vector_store %arg9[%c0_14, %c0_15], %17 {strides = array<i32>} : memref<16x128xf32, #tpu.memory_space<vmem>>, vector<16x128xf32>,
    return
  }
  func.func @transform_0(%arg0: i32, %arg1: i32) -> (i32, i32) {
    %c0_i32 = arith.constant 0 : i32
    %c0_i32_0 = arith.constant 0 : i32
    return %arg0, %c0_i32 : i32, i32
  }
  func.func @transform_1(%arg0: i32, %arg1: i32) -> (i32, i32) {
    %c0_i32 = arith.constant 0 : i32
    return %arg0, %arg1 : i32, i32
  }
  func.func @transform_2(%arg0: i32, %arg1: i32) -> (i32, i32) {
    %c0_i32 = arith.constant 0 : i32
    return %arg0, %arg1 : i32, i32
  }
  func.func @transform_3(%arg0: i32, %arg1: i32) -> (i32, i32) {
    %c0_i32 = arith.constant 0 : i32
    %c0_i32_0 = arith.constant 0 : i32
    return %c0_i32, %arg1 : i32, i32
  }
  func.func @transform_4(%arg0: i32, %arg1: i32) -> (i32, i32) {
    %c0_i32 = arith.constant 0 : i32
    %c0_i32_0 = arith.constant 0 : i32
    return %c0_i32, %arg1 : i32, i32
  }
  func.func @transform_5(%arg0: i32, %arg1: i32) -> (i32, i32) {
    %c0_i32 = arith.constant 0 : i32
    %c0_i32_0 = arith.constant 0 : i32
    return %c0_i32, %arg1 : i32, i32
  }
  func.func @transform_6(%arg0: i32, %arg1: i32) -> (i32, i32) {
    %c0_i32 = arith.constant 0 : i32
    %c0_i32_0 = arith.constant 0 : i32
    return %c0_i32, %arg1 : i32, i32
  }
  func.func @transform_7(%arg0: i32, %arg1: i32) -> (i32, i32) {
    %c0_i32 = arith.constant 0 : i32
    return %arg0, %arg1 : i32, i32
  }
}

</mosaic_0001>

<bundles_post_ra>
// kernel: blinear_apply.1
= control target key start
LH: loop header
LB: loop body
LE: loop exit
PB: predicated region body
PF: predicated region fallthrough
CT: control target
= control target key end

     0   :  { %s362_s4 = inlined_call_operand.vmem [shape: f32[128,128], index: 4, kind: input, shape index: {}]   ;;  %s363_s3 = inlined_call_operand.vmem [shape: f32[128,128], index: 3, kind: input, shape index: {}]   ;;  %s364_s0 = inlined_call_operand.vmem [shape: f32[16,128], index: 0, kind: input, shape index: {}]   ;;  %s365_s5 = inlined_call_operand.vmem [shape: f32[1,128], index: 5, kind: input, shape index: {}]   ;;  %s366_s6 = inlined_call_operand.vmem [shape: f32[1,128], index: 6, kind: input, shape index: {}]   ;;  %s367_s2 = inlined_call_operand.vmem [shape: f32[16,128], index: 2, kind: input, shape index: {}]   ;;  %s368_s1 = inlined_call_operand.vmem [shape: f32[16,128], index: 1, kind: input, shape index: {}]   ;;  %s369_s7 = inlined_call_operand.vmem [shape: f32[16,128], index: 7, kind: output, shape index: {}]  }
   0x1   :  { %v63_v0 = vld [vmem:[%s362_s4 + $0x78] sm:$0xff]  ;;  %v62_v1 = vld [vmem:[%s362_s4 + $0x70] sm:$0xff]  ;;  %v61_v2 = vld [vmem:[%s362_s4 + $0x68] sm:$0xff] }
   0x2   :  { %68 = vmatpush.msra.mxu0 %v63_v0  ;;  %158 = vmatpush.msra.mxu2 %v63_v0  ;;  %v60_v3 = vld [vmem:[%s362_s4 + $0x60] sm:$0xff]  ;;  %v47_v4 = vld [vmem:[%s363_s3 + $0x78] sm:$0xff]  ;;  %v46_v5 = vld [vmem:[%s363_s3 + $0x70] sm:$0xff] }
   0x3   :  { %v59_v6 = vld [vmem:[%s362_s4 + $0x58] sm:$0xff]  ;;  %117 = vmatpush.msra.mxu1 %v47_v4  ;;  %174 = vmatpush.msra.mxu3 %v47_v4  ;;  %v45_v7 = vld [vmem:[%s363_s3 + $0x68] sm:$0xff]  ;;  %v58_v8 = vld [vmem:[%s362_s4 + $0x50] sm:$0xff] }
   0x4   :  { %69 = vmatpush.msra.mxu0 %v62_v1  ;;  %159 = vmatpush.msra.mxu2 %v62_v1  ;;  %v44_v9 = vld [vmem:[%s363_s3 + $0x60] sm:$0xff]  ;;  %v57_v10 = vld [vmem:[%s362_s4 + $0x48] sm:$0xff]  ;;  %v43_v11 = vld [vmem:[%s363_s3 + $0x58] sm:$0xff] }
   0x5   :  { %118 = vmatpush.msra.mxu1 %v46_v5  ;;  %175 = vmatpush.msra.mxu3 %v46_v5  ;;  %v56_v12 = vld [vmem:[%s362_s4 + $0x40] sm:$0xff]  ;;  %v42_v13 = vld [vmem:[%s363_s3 + $0x50] sm:$0xff]  ;;  %v55_v14 = vld [vmem:[%s362_s4 + $0x38] sm:$0xff] }
   0x6   :  { %70 = vmatpush.msra.mxu0 %v61_v2  ;;  %160 = vmatpush.msra.mxu2 %v61_v2  ;;  %v41_v15 = vld [vmem:[%s363_s3 + $0x48] sm:$0xff]  ;;  %v54_v16 = vld [vmem:[%s362_s4 + $0x30] sm:$0xff]  ;;  %v40_v17 = vld [vmem:[%s363_s3 + $0x40] sm:$0xff] }
   0x7   :  { %119 = vmatpush.msra.mxu1 %v45_v7  ;;  %176 = vmatpush.msra.mxu3 %v45_v7  ;;  %v53_v18 = vld [vmem:[%s362_s4 + $0x28] sm:$0xff]  ;;  %v39_v19 = vld [vmem:[%s363_s3 + $0x38] sm:$0xff]  ;;  %v52_v20 = vld [vmem:[%s362_s4 + $0x20] sm:$0xff] }
   0x8   :  { %71 = vmatpush.msra.mxu0 %v60_v3  ;;  %161 = vmatpush.msra.mxu2 %v60_v3  ;;  %v38_v21 = vld [vmem:[%s363_s3 + $0x30] sm:$0xff]  ;;  %v51_v22 = vld [vmem:[%s362_s4 + $0x18] sm:$0xff]  ;;  %v37_v23 = vld [vmem:[%s363_s3 + $0x28] sm:$0xff] }
   0x9   :  { %120 = vmatpush.msra.mxu1 %v44_v9  ;;  %177 = vmatpush.msra.mxu3 %v44_v9  ;;  %v50_v24 = vld [vmem:[%s362_s4 + $0x10] sm:$0xff]  ;;  %v26_v25 = vld [vmem:[%s364_s0] sm:$0xff]  ;;  %v27_v26 = vld [vmem:[%s364_s0 + $0x8] sm:$0xff] }
   0xa   :  { %72 = vmatpush.msra.mxu0 %v59_v6  ;;  %162 = vmatpush.msra.mxu2 %v59_v6  ;;  %v36_v27 = vld [vmem:[%s363_s3 + $0x20] sm:$0xff]  ;;  %v49_v28 = vld [vmem:[%s362_s4 + $0x8] sm:$0xff]  ;;  %v35_v29 = vld [vmem:[%s363_s3 + $0x18] sm:$0xff]  ;;  %v66_v31 = vmul.f32 %v26_v25, %v26_v25  ;;  %v67_v32 = vmul.f32 %v27_v26, %v27_v26 }
   0xb   :  { %121 = vmatpush.msra.mxu1 %v43_v11  ;;  %178 = vmatpush.msra.mxu3 %v43_v11  ;;  %v48_v30 = vld [vmem:[%s362_s4] sm:$0xff]  ;;  %v34_v33 = vld [vmem:[%s363_s3 + $0x10] sm:$0xff]  ;;  %v33_v34 = vld [vmem:[%s363_s3 + $0x8] sm:$0xff] }
   0xc   :  { %73 = vmatpush.msra.mxu0 %v58_v8  ;;  %163 = vmatpush.msra.mxu2 %v58_v8  ;;  %v32_v35 = vld [vmem:[%s363_s3] sm:$0xff]  ;;  %v31_v59 = vld [vmem:[%s367_s2 + $0x8] sm:$0xff] }
   0xd   :  { %122 = vmatpush.msra.mxu1 %v42_v13  ;;  %179 = vmatpush.msra.mxu3 %v42_v13  ;;  %v190_v45 = vld [vmem:[%s366_s6] ss:$0 sm:$0xff]  ;;  %v29_v2 = vld [vmem:[%s368_s1 + $0x8] sm:$0xff] }
   0xe   :  { %74 = vmatpush.msra.mxu0 %v57_v10  ;;  %164 = vmatpush.msra.mxu2 %v57_v10  ;;  %v30_v46 = vld [vmem:[%s367_s2] sm:$0xff]  ;;  %v144_v1 = vmul.f32 %v190_v45, %v31_v59 }
   0xf   :  { %123 = vmatpush.msra.mxu1 %v41_v15  ;;  %180 = vmatpush.msra.mxu3 %v41_v15  ;;  %v143_v51 = vmul.f32 %v190_v45, %v30_v46  ;;  %v191_v52 = vld [vmem:[%s365_s5] ss:$0 sm:$0xff] }
  0x10   :  { %75 = vmatpush.msra.mxu0 %v56_v12  ;;  %165 = vmatpush.msra.mxu2 %v56_v12  ;;  %v28_v53 = vld [vmem:[%s368_s1] sm:$0xff]  ;;  %v149_v9 = vadd.f32 %v191_v52, %v144_v1 }
  0x11   :  { %124 = vmatpush.msra.mxu1 %v40_v17  ;;  %181 = vmatpush.msra.mxu3 %v40_v17  ;;  %v148_v61 = vadd.f32 %v191_v52, %v143_v51 }
  0x12   :  { %76 = vmatpush.msra.mxu0 %v55_v14  ;;  %166 = vmatpush.msra.mxu2 %v55_v14 }
  0x13   :  { %125 = vmatpush.msra.mxu1 %v39_v19  ;;  %182 = vmatpush.msra.mxu3 %v39_v19 }
  0x14   :  { %77 = vmatpush.msra.mxu0 %v54_v16  ;;  %167 = vmatpush.msra.mxu2 %v54_v16 }
  0x15   :  { %126 = vmatpush.msra.mxu1 %v38_v21  ;;  %183 = vmatpush.msra.mxu3 %v38_v21 }
  0x16   :  { %78 = vmatpush.msra.mxu0 %v53_v18  ;;  %168 = vmatpush.msra.mxu2 %v53_v18 }
  0x17   :  { %127 = vmatpush.msra.mxu1 %v37_v23  ;;  %184 = vmatpush.msra.mxu3 %v37_v23 }
  0x18   :  { %79 = vmatpush.msra.mxu0 %v52_v20  ;;  %169 = vmatpush.msra.mxu2 %v52_v20 }
  0x19   :  { %128 = vmatpush.msra.mxu1 %v36_v27  ;;  %185 = vmatpush.msra.mxu3 %v36_v27 }
  0x1a   :  { %80 = vmatpush.msra.mxu0 %v51_v22  ;;  %170 = vmatpush.msra.mxu2 %v51_v22 }
  0x1b   :  { %129 = vmatpush.msra.mxu1 %v35_v29  ;;  %186 = vmatpush.msra.mxu3 %v35_v29 }
  0x1c   :  { %81 = vmatpush.msra.mxu0 %v50_v24  ;;  %171 = vmatpush.msra.mxu2 %v50_v24 }
  0x1d   :  { %130 = vmatpush.msra.mxu1 %v34_v33  ;;  %187 = vmatpush.msra.mxu3 %v34_v33 }
  0x1e   :  { %82 = vmatpush.msra.mxu0 %v49_v28  ;;  %172 = vmatpush.msra.mxu2 %v49_v28 }
  0x1f   :  { %131 = vmatpush.msra.mxu1 %v33_v34  ;;  %188 = vmatpush.msra.mxu3 %v33_v34 }
  0x20   :  { %83 = vmatpush.msra.mxu0 %v48_v30  ;;  %173 = vmatpush.msra.mxu2 %v48_v30 }
  0x21   :  { %84 = vmatmul.f32.vlgmr.msra.gmra.mxu0 %v66_v31  ;;  %87 = vmatmul.f32.vlgmr.msra.gmra.mxu2 %v67_v32 }
  0x22   :  { %132 = vmatpush.msra.mxu1 %v32_v35  ;;  %189 = vmatpush.msra.mxu3 %v32_v35 }
  0x23   :  { %133 = vmatmul.f32.vlgmr.msra.gmra.mxu1 %v26_v25  ;;  %136 = vmatmul.f32.vlgmr.msra.gmra.mxu3 %v27_v26 }
  0x9e   :  { %v85_v36 = vpop.f32.mrf.mxu0 }
  0x9f   :  { %192 = vrsqrt.f32 %v85_v36  ;;  %vm98_vm0 = vcmp.eq.f32.partialorder %v85_v36, inf  ;;  %v101_v54 = vand.u32 2147483648, %v85_v36  ;;  %vm100_vm1 = vcmp.eq.f32.partialorder %v85_v36, 0.0 }
  0xa0   :  { %v134_v58 = vpop.f32.mrf.mxu1 }
  0xa4   :  { %v88_v37 = vpop.f32.mrf.mxu2 }
  0xa5   :  { %v193_v38 = vpop.eup %192  ;;  %194 = vrsqrt.f32 %v88_v37  ;;  %vm110_vm2 = vcmp.eq.f32.partialorder %v88_v37, inf  ;;  %v113_v3 = vand.u32 2147483648, %v88_v37  ;;  %vm112_vm3 = vcmp.eq.f32.partialorder %v88_v37, 0.0 }
  0xa6   :  { %v92_v39 = vmul.f32 %v193_v38, %v85_v36  ;;  %v137_v7 = vpop.f32.mrf.mxu3 }
  0xa8   :  { %v93_v40 = vmul.f32 %v193_v38, %v92_v39 }
  0xaa   :  { %v94_v41 = vmul.f32 0.5, %v93_v40 }
  0xab   :  { %v195_v42 = vpop.eup %194 }
  0xac   :  { %v104_v43 = vmul.f32 %v195_v42, %v88_v37  ;;  %v95_v44 = vsub.f32 1.5, %v94_v41 }
  0xae   :  { %v105_v47 = vmul.f32 %v195_v42, %v104_v43  ;;  %v96_v48 = vmul.f32 %v193_v38, %v95_v44 }
  0xb0   :  { %v106_v49 = vmul.f32 0.5, %v105_v47  ;;  %v97_v50 = vmul.f32 %v96_v48, %v85_v36 }
  0xb2   :  { %v99_v55 = vsel %vm98_vm0, %v85_v36, %v97_v50  ;;  %v107_v56 = vsub.f32 1.5, %v106_v49 }
  0xb3   :  { %v102_v57 = vsel %vm100_vm1, %v101_v54, %v99_v55 }
  0xb4   :  { %v115_v60 = vmul.f32 %v102_v57, %v28_v53  ;;  %v108_v62 = vmul.f32 %v195_v42, %v107_v56 }
  0xb6   :  { %v135_v63 = vadd.f32 %v134_v58, %v115_v60  ;;  %v109_v0 = vmul.f32 %v108_v62, %v88_v37 }
  0xb8   :  { %v150_v4 = vadd.f32 %v148_v61, %v135_v63  ;;  %v111_v5 = vsel %vm110_vm2, %v88_v37, %v109_v0 }
  0xb9   :  { %v114_v6 = vsel %vm112_vm3, %v113_v3, %v111_v5 }
  0xba   :  { %152 = vst [vmem:[%s369_s7] sm:$0xff] %v150_v4  ;;  %v116_v8 = vmul.f32 %v114_v6, %v29_v2 }
  0xbc   :  { %v138_v10 = vadd.f32 %v137_v7, %v116_v8 }
  0xbe   :  { %v151_v11 = vadd.f32 %v149_v9, %v138_v10 }
  0xc0   :  { %153 = vst [vmem:[%s369_s7 + $0x8] sm:$0xff] %v151_v11 }

</bundles_post_ra>
